<compile_context>
chip_gen: v7x
topology: tpu7x:2x2x1
jax: 0.10.0
libtpu: 0.0.40
codegen_flags: <defaults>
</compile_context>

<pallas_src>
import jax
import jax.numpy as jnp
from jax.experimental import pallas as pl
from jax.experimental.pallas import tpu as pltpu


def _round_up(x: int, m: int) -> int:
    return ((x + m - 1) // m) * m


def _mdn_kernel(h_ref, wa_ref, wm_ref, ws_ref, ba_ref, bm_ref, bs_ref,
                alpha_ref, mu_ref, sigma_ref):
    """One row-tile of the MDN head.

    h_ref : (TM, H) activations
    w*_ref: (H, G) / (H, G*L) / (H, G*L) column-split weights (act dtype)
    b*_ref: (1, G) / (1, G*L) / (1, G*L) column-split biases (f32)
    outputs: alpha (TM, G) softmax, mu (TM, G*L) affine, sigma (TM, G*L) exp.
    """
    h = h_ref[...]

    # --- mu head: plain affine (f32 accumulation on the MXU) ---
    mu = jnp.dot(h, wm_ref[...], preferred_element_type=jnp.float32) + bm_ref[...]
    mu_ref[...] = mu.astype(mu_ref.dtype)

    # --- sigma head: exp(affine); single exp per element ---
    zs = jnp.dot(h, ws_ref[...], preferred_element_type=jnp.float32) + bs_ref[...]
    sigma_ref[...] = jnp.exp(zs).astype(sigma_ref.dtype)

    # --- alpha head: numerically-stable softmax over the G mixture logits ---
    za = jnp.dot(h, wa_ref[...], preferred_element_type=jnp.float32) + ba_ref[...]
    za = za - jnp.max(za, axis=-1, keepdims=True)
    e = jnp.exp(za)
    s = jnp.sum(e, axis=-1, keepdims=True)
    # Exact per-row reciprocal: negligible cost (one per row, not per element)
    # and keeps each alpha row summing to 1.0 exactly for downstream losses.
    alpha_ref[...] = (e * pl.reciprocal(s, approx=False)).astype(alpha_ref.dtype)


def _choose_row_tile(M: int, row_tile: int) -> int:
    """Pick the row tile TM.

    Constraints / goals:
      * TM % 8 == 0 (sublane granularity) or TM == M (tiny inputs).
      * TM <= M (never request a block larger than the array).
      * TM large enough to amortize the ~0.35 us per-grid-step overhead
        (default cap 4096, re-budgeted for v7x's 64 MiB VMEM).
      * >= 2 grid steps whenever M allows it, so the "parallel" axis actually
        splits across v7x's two TensorCores.
    """
    if M <= 8:
        return M                                   # one block == full array
    tm = max(8, (min(row_tile, M) // 8) * 8)       # multiple of 8, <= M
    if pl.cdiv(M, tm) < 2:                         # keep both v7x TCs busy
        half = max(8, _round_up(pl.cdiv(M, 2), 8))
        tm = min(tm, half)
    return tm


def mdn_forward(hidden_state, weight, bias, *, num_gaussians, latent_dim,
                row_tile=4096):
    """hidden_state: (B, T, H); weight: (D, H) nn.Linear layout; bias: (D,)."""
    B, T, H = hidden_state.shape
    G, L = num_gaussians, latent_dim
    GL = G * L
    D = G * (2 * L + 1)
    assert weight.shape == (D, H)
    assert bias.shape == (D,)

    M = B * T
    TM = _choose_row_tile(M, row_tile)
    grid = (pl.cdiv(M, TM),)                       # ragged last block is fine

    act_dtype = hidden_state.dtype                 # bf16 stays bf16
    out_dtype = act_dtype
    h2d = hidden_state.reshape(M, H)               # free reshape, no pad pass

    # Column-split the (tiny) weight/bias once on the wrapper side so every
    # head's matmul result is lane-aligned at offset 0 -> no in-kernel masks,
    # selects, or non-128-aligned lane slices.
    w_t = weight.T.astype(act_dtype)               # (H, D)
    wa, wm, ws = w_t[:, :G], w_t[:, G:G + GL], w_t[:, G + GL:]
    b32 = bias.astype(jnp.float32)
    ba = b32[:G].reshape(1, G)
    bm = b32[G:G + GL].reshape(1, GL)
    bs = b32[G + GL:].reshape(1, GL)

    in_bytes = jnp.dtype(act_dtype).itemsize
    out_bytes = jnp.dtype(out_dtype).itemsize
    cost = pl.CostEstimate(
        flops=2 * M * H * D,
        transcendentals=M * (G + GL),              # one exp per alpha/sigma elem
        bytes_accessed=(M * H * in_bytes + M * D * out_bytes
                        + D * H * in_bytes + D * 4),
    )

    alpha2d, mu2d, sigma2d = pl.pallas_call(
        _mdn_kernel,
        out_shape=(
            jax.ShapeDtypeStruct((M, G), out_dtype),
            jax.ShapeDtypeStruct((M, GL), out_dtype),
            jax.ShapeDtypeStruct((M, GL), out_dtype),
        ),
        grid=grid,
        in_specs=[
            pl.BlockSpec((TM, H), lambda i: (i, 0)),   # row-tiled activations
            pl.BlockSpec((H, G), lambda i: (0, 0)),    # resident weights
            pl.BlockSpec((H, GL), lambda i: (0, 0)),
            pl.BlockSpec((H, GL), lambda i: (0, 0)),
            pl.BlockSpec((1, G), lambda i: (0, 0)),    # resident biases
            pl.BlockSpec((1, GL), lambda i: (0, 0)),
            pl.BlockSpec((1, GL), lambda i: (0, 0)),
        ],
        out_specs=[
            pl.BlockSpec((TM, G), lambda i: (i, 0)),
            pl.BlockSpec((TM, GL), lambda i: (i, 0)),
            pl.BlockSpec((TM, GL), lambda i: (i, 0)),
        ],
        compiler_params=pltpu.CompilerParams(
            dimension_semantics=("parallel",),         # 2-TC split on v7x
            vmem_limit_bytes=48 * 1024 * 1024),        # explicit, < v7x 64 MiB
        cost_estimate=cost,
    )(h2d, wa, wm, ws, ba, bm, bs)

    alpha = alpha2d.reshape(B, T, G)
    mu = mu2d.reshape(B, T, G, L)
    sigma = sigma2d.reshape(B, T, G, L)
    return alpha, mu, sigma


def mdn_forward_ref(hidden_state, weight, bias, *, num_gaussians, latent_dim):
    """Pure-JAX reference mirroring the PyTorch forward."""
    B, T, H = hidden_state.shape
    G, L = num_gaussians, latent_dim
    out = (hidden_state.astype(jnp.float32) @ weight.T.astype(jnp.float32)
           + bias.astype(jnp.float32))
    alpha = jax.nn.softmax(out[:, :, :G], axis=-1)
    mu = out[:, :, G:G + G * L].reshape(B, T, G, L)
    sigma = jnp.exp(out[:, :, G + G * L:].reshape(B, T, G, L))
    return alpha, mu, sigma


if __name__ == "__main__":
    # Shapes consistent with the module's forward:
    #   hidden_state: (batch=2, num_frames=8, hidden_dim=32)
    #   latent_dim=4, num_gaussians=5  ->  output dim = 5*(2*4+1) = 45
    latent_dim, num_gaussians, hidden_dim = 4, 5, 32
    out_dim = num_gaussians * (2 * latent_dim + 1)

    key = jax.random.PRNGKey(0)
    k_h1, k_h2, k_w, k_b = jax.random.split(key, 4)

    # Deterministic nn.Linear-style init: U(-1/sqrt(H), 1/sqrt(H))
    bound = 1.0 / (hidden_dim ** 0.5)
    weight = jax.random.uniform(k_w, (out_dim, hidden_dim), minval=-bound,
                                maxval=bound, dtype=jnp.float32)
    bias = jax.random.uniform(k_b, (out_dim,), minval=-bound, maxval=bound,
                              dtype=jnp.float32)

    def run_and_check(hidden_state):
        alpha, mu, sigma = mdn_forward(
            hidden_state, weight, bias,
            num_gaussians=num_gaussians, latent_dim=latent_dim)
        jax.block_until_ready((alpha, mu, sigma))

        a_ref, m_ref, s_ref = mdn_forward_ref(
            hidden_state, weight, bias,
            num_gaussians=num_gaussians, latent_dim=latent_dim)
        B, T, _ = hidden_state.shape
        assert alpha.shape == (B, T, num_gaussians)
        assert mu.shape == (B, T, num_gaussians, latent_dim)
        assert sigma.shape == (B, T, num_gaussians, latent_dim)
        assert jnp.allclose(alpha, a_ref, atol=1e-5, rtol=1e-5)
        assert jnp.allclose(mu, m_ref, atol=1e-5, rtol=1e-5)
        assert jnp.allclose(sigma, s_ref, atol=1e-4, rtol=1e-5)

    # Primary small shape from the module.
    h1 = jax.random.normal(k_h1, (2, 8, hidden_dim), dtype=jnp.float32)
    run_and_check(h1)

    # Row count not a multiple of the tile -> exercises the ragged last block
    # (no wrapper-side padding pass).
    h2 = jax.random.normal(k_h2, (3, 5, hidden_dim), dtype=jnp.float32)
    run_and_check(h2)

    print("KERNEL_OK")
</pallas_src>

<mosaic_0001>
module attributes {stable_mosaic.version = 11 : i64} {
  func.func @_mdn_kernel(%arg0: i32, %arg1: memref<8x32xf32, #tpu.memory_space<vmem>>, %arg2: memref<32x5xf32, #tpu.memory_space<vmem>>, %arg3: memref<32x20xf32, #tpu.memory_space<vmem>>, %arg4: memref<32x20xf32, #tpu.memory_space<vmem>>, %arg5: memref<1x5xf32, #tpu.memory_space<vmem>>, %arg6: memref<1x20xf32, #tpu.memory_space<vmem>>, %arg7: memref<1x20xf32, #tpu.memory_space<vmem>>, %arg8: memref<8x5xf32, #tpu.memory_space<vmem>>, %arg9: memref<8x20xf32, #tpu.memory_space<vmem>>, %arg10: memref<8x20xf32, #tpu.memory_space<vmem>>) attributes {dimension_semantics = [#tpu.dimension_semantics<parallel>], iteration_bounds = array<i64: 2>, scalar_prefetch = 0 : i64, scratch_operands = 0 : i64, tpu.core_type = #tpu.core_type<tc>, window_params = [{transform_indices = @transform_0, window_bounds = array<i64: 8, 32>}, {pipeline_mode = #tpu.pipeline_mode<synchronous>, transform_indices = @transform_1, window_bounds = array<i64: 32, 5>}, {pipeline_mode = #tpu.pipeline_mode<synchronous>, transform_indices = @transform_2, window_bounds = array<i64: 32, 20>}, {pipeline_mode = #tpu.pipeline_mode<synchronous>, transform_indices = @transform_3, window_bounds = array<i64: 32, 20>}, {pipeline_mode = #tpu.pipeline_mode<synchronous>, transform_indices = @transform_4, window_bounds = array<i64: 1, 5>}, {pipeline_mode = #tpu.pipeline_mode<synchronous>, transform_indices = @transform_5, window_bounds = array<i64: 1, 20>}, {pipeline_mode = #tpu.pipeline_mode<synchronous>, transform_indices = @transform_6, window_bounds = array<i64: 1, 20>}, {transform_indices = @transform_7, window_bounds = array<i64: 8, 5>}, {transform_indices = @transform_8, window_bounds = array<i64: 8, 20>}, {transform_indices = @transform_9, window_bounds = array<i64: 8, 20>}]} {
    %c0 = arith.constant 0 : index
    %c0_0 = arith.constant 0 : index
    %0 = vector.load %arg1[%c0, %c0_0] : memref<8x32xf32, #tpu.memory_space<vmem>>, vector<8x32xf32>
    %c0_1 = arith.constant 0 : index
    %c0_2 = arith.constant 0 : index
    %1 = vector.load %arg3[%c0_1, %c0_2] : memref<32x20xf32, #tpu.memory_space<vmem>>, vector<32x20xf32>
    %cst = arith.constant dense<0.000000e+00> : vector<8x20xf32>
    %2 = tpu.matmul %0, %1, %cst {dimension_numbers = #tpu.dot_dimension_numbers<[1], [0], [0], [1], [0, 0, 1, 1], [], []>} : vector<8x32xf32>, vector<32x20xf32>, vector<8x20xf32> -> vector<8x20xf32>
    %c0_3 = arith.constant 0 : index
    %c0_4 = arith.constant 0 : index
    %3 = vector.load %arg6[%c0_3, %c0_4] : memref<1x20xf32, #tpu.memory_space<vmem>>, vector<1x20xf32>
    %4 = vector.broadcast %3 : vector<1x20xf32> to vector<8x20xf32>
    %5 = arith.addf %2, %4 : vector<8x20xf32>
    %c0_5 = arith.constant 0 : index
    %c0_6 = arith.constant 0 : index
    %6 = vector.load %arg9[%c0_5, %c0_6] : memref<8x20xf32, #tpu.memory_space<vmem>>, vector<8x20xf32>
    tpu.vector_store %arg9[%c0_5, %c0_6], %5 {strides = array<i32>} : memref<8x20xf32, #tpu.memory_space<vmem>>, vector<8x20xf32>,
    %c0_7 = arith.constant 0 : index
    %c0_8 = arith.constant 0 : index
    %7 = vector.load %arg4[%c0_7, %c0_8] : memref<32x20xf32, #tpu.memory_space<vmem>>, vector<32x20xf32>
    %cst_9 = arith.constant dense<0.000000e+00> : vector<8x20xf32>
    %8 = tpu.matmul %0, %7, %cst_9 {dimension_numbers = #tpu.dot_dimension_numbers<[1], [0], [0], [1], [0, 0, 1, 1], [], []>} : vector<8x32xf32>, vector<32x20xf32>, vector<8x20xf32> -> vector<8x20xf32>
    %c0_10 = arith.constant 0 : index
    %c0_11 = arith.constant 0 : index
    %9 = vector.load %arg7[%c0_10, %c0_11] : memref<1x20xf32, #tpu.memory_space<vmem>>, vector<1x20xf32>
    %10 = vector.broadcast %9 : vector<1x20xf32> to vector<8x20xf32>
    %11 = arith.addf %8, %10 : vector<8x20xf32>
    %12 = math.exp %11 : vector<8x20xf32>
    %c0_12 = arith.constant 0 : index
    %c0_13 = arith.constant 0 : index
    %13 = vector.load %arg10[%c0_12, %c0_13] : memref<8x20xf32, #tpu.memory_space<vmem>>, vector<8x20xf32>
    tpu.vector_store %arg10[%c0_12, %c0_13], %12 {strides = array<i32>} : memref<8x20xf32, #tpu.memory_space<vmem>>, vector<8x20xf32>,
    %c0_14 = arith.constant 0 : index
    %c0_15 = arith.constant 0 : index
    %14 = vector.load %arg2[%c0_14, %c0_15] : memref<32x5xf32, #tpu.memory_space<vmem>>, vector<32x5xf32>
    %cst_16 = arith.constant dense<0.000000e+00> : vector<8x5xf32>
    %15 = tpu.matmul %0, %14, %cst_16 {dimension_numbers = #tpu.dot_dimension_numbers<[1], [0], [0], [1], [0, 0, 1, 1], [], []>} : vector<8x32xf32>, vector<32x5xf32>, vector<8x5xf32> -> vector<8x5xf32>
    %c0_17 = arith.constant 0 : index
    %c0_18 = arith.constant 0 : index
    %16 = vector.load %arg5[%c0_17, %c0_18] : memref<1x5xf32, #tpu.memory_space<vmem>>, vector<1x5xf32>
    %17 = vector.broadcast %16 : vector<1x5xf32> to vector<8x5xf32>
    %18 = arith.addf %15, %17 : vector<8x5xf32>
    %cst_19 = arith.constant dense<0xFF800000> : vector<8xf32>
    %19 = vector.multi_reduction <maximumf>, %18, %cst_19 [1] : vector<8x5xf32> to vector<8xf32>
    %20 = vector.shape_cast %19 : vector<8xf32> to vector<8x1xf32>
    %21 = vector.broadcast %20 : vector<8x1xf32> to vector<8x5xf32>
    %22 = arith.subf %18, %21 : vector<8x5xf32>
    %23 = math.exp %22 : vector<8x5xf32>
    %cst_20 = arith.constant dense<0.000000e+00> : vector<8xf32>
    %24 = vector.multi_reduction <add>, %23, %cst_20 [1] : vector<8x5xf32> to vector<8xf32>
    %25 = vector.shape_cast %24 : vector<8xf32> to vector<8x1xf32>
    %26 = tpu.reciprocal %25 : vector<8x1xf32> -> vector<8x1xf32>
    %27 = vector.broadcast %26 : vector<8x1xf32> to vector<8x5xf32>
    %28 = arith.mulf %23, %27 : vector<8x5xf32>
    %c0_21 = arith.constant 0 : index
    %c0_22 = arith.constant 0 : index
    %29 = vector.load %arg8[%c0_21, %c0_22] : memref<8x5xf32, #tpu.memory_space<vmem>>, vector<8x5xf32>
    tpu.vector_store %arg8[%c0_21, %c0_22], %28 {strides = array<i32>} : memref<8x5xf32, #tpu.memory_space<vmem>>, vector<8x5xf32>,
    return
  }
  func.func @transform_0(%arg0: i32) -> (i32, i32) {
    %c0_i32 = arith.constant 0 : i32
    %c0_i32_0 = arith.constant 0 : i32
    return %arg0, %c0_i32 : i32, i32
  }
  func.func @transform_1(%arg0: i32) -> (i32, i32) {
    %c0_i32 = arith.constant 0 : i32
    %c0_i32_0 = arith.constant 0 : i32
    %c0_i32_1 = arith.constant 0 : i32
    return %c0_i32, %c0_i32_0 : i32, i32
  }
  func.func @transform_2(%arg0: i32) -> (i32, i32) {
    %c0_i32 = arith.constant 0 : i32
    %c0_i32_0 = arith.constant 0 : i32
    %c0_i32_1 = arith.constant 0 : i32
    return %c0_i32, %c0_i32_0 : i32, i32
  }
  func.func @transform_3(%arg0: i32) -> (i32, i32) {
    %c0_i32 = arith.constant 0 : i32
    %c0_i32_0 = arith.constant 0 : i32
    %c0_i32_1 = arith.constant 0 : i32
    return %c0_i32, %c0_i32_0 : i32, i32
  }
  func.func @transform_4(%arg0: i32) -> (i32, i32) {
    %c0_i32 = arith.constant 0 : i32
    %c0_i32_0 = arith.constant 0 : i32
    %c0_i32_1 = arith.constant 0 : i32
    return %c0_i32, %c0_i32_0 : i32, i32
  }
  func.func @transform_5(%arg0: i32) -> (i32, i32) {
    %c0_i32 = arith.constant 0 : i32
    %c0_i32_0 = arith.constant 0 : i32
    %c0_i32_1 = arith.constant 0 : i32
    return %c0_i32, %c0_i32_0 : i32, i32
  }
  func.func @transform_6(%arg0: i32) -> (i32, i32) {
    %c0_i32 = arith.constant 0 : i32
    %c0_i32_0 = arith.constant 0 : i32
    %c0_i32_1 = arith.constant 0 : i32
    return %c0_i32, %c0_i32_0 : i32, i32
  }
  func.func @transform_7(%arg0: i32) -> (i32, i32) {
    %c0_i32 = arith.constant 0 : i32
    %c0_i32_0 = arith.constant 0 : i32
    return %arg0, %c0_i32 : i32, i32
  }
  func.func @transform_8(%arg0: i32) -> (i32, i32) {
    %c0_i32 = arith.constant 0 : i32
    %c0_i32_0 = arith.constant 0 : i32
    return %arg0, %c0_i32 : i32, i32
  }
  func.func @transform_9(%arg0: i32) -> (i32, i32) {
    %c0_i32 = arith.constant 0 : i32
    %c0_i32_0 = arith.constant 0 : i32
    return %arg0, %c0_i32 : i32, i32
  }
}

</mosaic_0001>

<bundles_post_ra>
// kernel: tpu_custom_call.1
= control target key start
LH: loop header
LB: loop body
LE: loop exit
PB: predicated region body
PF: predicated region fallthrough
CT: control target
= control target key end

     0   :  { %s1262_s0 = inlined_call_operand.vmem [shape: f32[16,32], index: 0, kind: input, shape index: {}]   ;;  %s1263_s1 = inlined_call_operand.vmem [shape: f32[32,5], index: 1, kind: input, shape index: {}]   ;;  %s1264_s2 = inlined_call_operand.vmem [shape: f32[32,20], index: 2, kind: input, shape index: {}]   ;;  %s1265_s3 = inlined_call_operand.vmem [shape: f32[32,20], index: 3, kind: input, shape index: {}]   ;;  %s1266_s4 = inlined_call_operand.vmem [shape: f32[1,5], index: 4, kind: input, shape index: {}]   ;;  %s1267_s5 = inlined_call_operand.vmem [shape: f32[1,20], index: 5, kind: input, shape index: {}]   ;;  %s1268_s6 = inlined_call_operand.vmem [shape: f32[1,20], index: 6, kind: input, shape index: {}]   ;;  %s1269_s7 = inlined_call_operand.vmem [shape: f32[16,5], index: 7, kind: output, shape index: {0}]   ;;  %s1270_s8 = inlined_call_operand.hbm [shape: f32[16,20], index: 8, kind: output, shape index: {1}]   ;;  %s1271_s9 = inlined_call_operand.hbm [shape: f32[16,20], index: 9, kind: output, shape index: {2}]  }
   0x1   :  { %1274 = sst [smem:[#allocation8_spill]] %s1262_s0 }
   0x2   :  { %1275 = sst [smem:[#allocation9_spill]] %s1263_s1 }
   0x3   :  { %1276 = sst [smem:[#allocation10_spill]] %s1264_s2 }
   0x4   :  { %1277 = sst [smem:[#allocation11_spill]] %s1265_s3 }
   0x5   :  { %15 = vsyncpa [#allocation3], 0 }
   0x6   :  { %17 = vsyncpa [#allocation3 + $0x1], 0 }
   0x7   :  { %18 = vsyncpa [#allocation5], 0 }
   0x8   :  { %20 = vsyncpa [#allocation5 + $0x1], 0  ;;  %s1059_s30 = smov 0   ;;  %s1061_s10 = smov 0  }
   0x9   :  { %s1063_s11 = smov 0   ;;  %s1065_s12 = smov 0  }
   0xa LB: > { %s1080_s13 = sadd.s32 4294967295, %s1002_s12   ;;  %s769_s14 = sadd.s32 4294967294, %s1002_s12   ;;  %s1002_s12 = sphi %s1065_s12, %s1289_s12   ;;  %s998_s11 = sphi %s1063_s11, %s1288_s11   ;;  %s994_s10 = sphi %s1061_s10, %s1287_s10   ;;  %s990_s30 = sphi %s1059_s30, %s1286_s30  }
   0xb   : > { %s1084_s15 = sadd.s32 1, %s1002_s12   ;;  %s211_s16 = sadd.s32 1, %s998_s11 }
   0xc   : > { %s208_s17 = ssub.s32 %s1002_s12, %s1084_s15  ;;  %p221_p0 = scmp.ne.s32.totalorder %s998_s11, %s994_s10 }
   0xd   : > { %p209_p1 = scmp.eq.s32.totalorder %s208_s17, 0  ;;  %p222_p2 = scmp.eq.s32.totalorder %s1080_s13, 1 }
   0xe   : > { %p227_p3 = scmp.ne.s32.totalorder %s994_s10, %s990_s30  ;;  %p228_p4 = scmp.eq.s32.totalorder %s769_s14, 1 }
   0xf   : > { %s1095_s18 = scalar_select %p209_p1, %s998_s11, %s211_s16  }
  0x10   : > { %p1097_p5 = por %p222_p2, %p221_p0  ;;  %p1101_p6 = por %p228_p4, %p227_p3 }
  0x11   : > { %p772_p7 = scmp.ge.s32.totalorder %s1002_s12, 1  ;;  %p297_p8 = scmp.lt.s32.totalorder %s1002_s12, 3 }
  0x13   : > { %p298_p9 = pnand %p772_p7, %p297_p8 }
  0x14   : > { %s1280_s2 = sld [smem:[#allocation10_spill]] (!%p298_p9)  ;;  %v1004_v3 = vmov (!%p298_p9), 0.0|0.0   ;;  %vm1005_vm0 = vmmov (!%p298_p9), 0   ;;  %v1006_v6 = vmov (!%p298_p9), 0.0   ;;  %p341_p10 = scmp.lt.s32.totalorder (!%p298_p9), %s1080_s13, 1  ;;  %vm361_vm1 = vcmask (!%p298_p9), 261120  }
  0x15   : > { %301 = sbr.rel (%p298_p9) target bundleno = 573 (0x23d), region = 48  ;;  %837 = vmatprep.subr.bf16.mxu0 (!%p298_p9), %v1004_v3  ;;  %812 = vmatprep.mubr.msk.f32.mxu0 (!%p298_p9), %vm1005_vm0, %v1006_v6  ;;  %s1281_s1 = sld [smem:[#allocation9_spill]] (!%p298_p9)  ;;  %v777_v21 = vld [vmem:[%s1267_s5] ss:$0 sm:$0xff] (!%p298_p9)  ;;  %vm435_vm2 = vcmask (!%p298_p9), 162816   ;;  %vm602_vm3 = vcmask (!%p298_p9), 39936  }
  0x16   : > { %843 = vmatprep.subr.bf16.mxu1 (!%p298_p9), %v1004_v3  ;;  %823 = vmatprep.mubr.msk.f32.mxu1 (!%p298_p9), %vm1005_vm0, %v1006_v6  ;;  %s1282_s0 = sld [smem:[#allocation8_spill]] (!%p298_p9)  ;;  %s1283_s3 = sld [smem:[#allocation11_spill]] (!%p298_p9)  ;;  %v781_v25 = vld [vmem:[%s1266_s4] ss:$0 sm:$0xff] (!%p298_p9) }
  0x17   : > { %s1160_s28 = sand.u32 (!%p298_p9), 1, %s994_s10   ;;  %v779_v37 = vld [vmem:[%s1268_s6] ss:$0 sm:$0xff] (!%p298_p9)  ;;  %s1273_s27 = sshll.u32 (!%p298_p9), %s1080_s13, 7 }
  0x18   : > { %s773_s14 = sshll.u32 (!%p298_p9), %s1160_s28, 3 }
  0x19   : > { %s333_s21 = scalar_lea.vmem (!%p298_p9), [#allocation2], %s773_s14  ;;  %s1183_s17 = scalar_lea.vmem (!%p298_p9), [#allocation4], %s773_s14 }
  0x1a   : > { %v350_v0 = vld [vmem:[%s1280_s2] sm:$0xff] (!%p298_p9)  ;;  %v351_v1 = vld [vmem:[%s1280_s2 + $0x8] sm:$0xff] (!%p298_p9)  ;;  %v352_v2 = vld [vmem:[%s1280_s2 + $0x10] sm:$0xff] (!%p298_p9)  ;;  %s641_s16 = sshll.u32 (!%p298_p9), %s333_s21, 4  ;;  %s642_s16 = int_to_ptr.vmem [resolvable:$true] %s641_s16 }
  0x1b   : > { %v838_v4 = vpack.c.bf16 (!%p298_p9), %v351_v1, %v350_v0  ;;  %v353_v5 = vld [vmem:[%s1280_s2 + $0x18] sm:$0xff] (!%p298_p9)  ;;  %v521_v8 = vld [vmem:[%s1281_s1] sm:$0xff] (!%p298_p9)  ;;  %v522_v9 = vld [vmem:[%s1281_s1 + $0x8] sm:$0xff] (!%p298_p9)  ;;  %s908_s26 = scalar_lea.vmem (!%p298_p9), %s642_s16, 128 }
  0x1c   : > { %v841_v7 = vpack.c.bf16 %v353_v5, %v352_v2  ;;  %s1123_s29 = scalar_select %p341_p10, %s1080_s13, 1  ;;  %v850_v11 = vpack.c.bf16 %v522_v9, %v521_v8  ;;  %v523_v12 = vld [vmem:[%s1281_s1 + $0x10] sm:$0xff]  ;;  %v524_v13 = vld [vmem:[%s1281_s1 + $0x18] sm:$0xff]  ;;  %v437_v15 = vld [vmem:[%s1283_s3] sm:$0xff] }
  0x1d   : > { %839 = vmatpush3.bf16.msra.mxu0 %v838_v4  ;;  %v853_v14 = vpack.c.bf16 %v524_v13, %v523_v12  ;;  %v438_v16 = vld [vmem:[%s1283_s3 + $0x8] sm:$0xff]  ;;  %v439_v17 = vld [vmem:[%s1283_s3 + $0x10] sm:$0xff]  ;;  %v440_v19 = vld [vmem:[%s1283_s3 + $0x18] sm:$0xff]  ;;  %p909_p11 = scmp.ne.s32.totalorder %s642_s16, %s908_s26 }
  0x1e   : > { %840 = vmatprep.subr.bf16.mxu0 %v1004_v3  ;;  %s1272_s22 = sshll.u32 %s1123_s29, 3  ;;  %v844_v18 = vpack.c.bf16 %v438_v16, %v437_v15  ;;  %v847_v20 = vpack.c.bf16 %v440_v19, %v439_v17 }
  0x1f   : > { %s344_s25 = scalar_lea.vmem %s1282_s0, %s1272_s22  ;;  %s1192_s22 = scalar_lea.hbm %s1270_s8, %s1273_s27 }
  0x20   : > { %v349_v10 = vld [vmem:[%s344_s25] sm:$0xff]  ;;  %845 = vmatpush3.bf16.msra.mxu1 %v844_v18  ;;  %s620_s25 = scalar_lea.sflag [#allocation3], %s1160_s28  ;;  %p910_p12 = pnand %p909_p11, %p1097_p5 }
  0x21   : > { %842 = vmatpush3.bf16.msra.mxu0 %v841_v7  ;;  %846 = vmatprep.subr.bf16.mxu1 %v1004_v3 }
  0x22   : > { %849 = vmatprep.subr.bf16.mxu0 %v1004_v3  ;;  %p911_p13 = pneg %p910_p12 }
  0x24   : > { %813 = vmatmul.mubr.msk.f32.vlgmr.msra.gmra.mrb[0].mxu0 %vm361_vm1, %v349_v10  ;;  %848 = vmatpush3.bf16.msra.mxu1 %v847_v20 }
  0x25   : > { %851 = vmatpush3.bf16.msra.mxu0 %v850_v11  ;;  %834 = vmatprep.mubr.msk.f32.mxu0 %vm1005_vm0, %v1006_v6 }
  0x26   : > { %852 = vmatprep.subr.bf16.mxu0 %v1004_v3 }
  0x27   : > { %824 = vmatmul.mubr.msk.f32.vlgmr.msra.gmra.mrb[0].mxu1 %vm361_vm1, %v349_v10 }
  0x29   : > { %854 = vmatpush3.bf16.msra.mxu0 %v853_v14 }
  0x2c   : > { %835 = vmatmul.mubr.msk.f32.vlgmr.msra.gmra.mrb[2].mxu0 %vm361_vm1, %v349_v10 }
  0xf7   : > { %v431_v22 = vpop.f32.mrb[0].mxu0 }
  0xf8   : > { %v432_v23 = vadd.f32 %v777_v21, %v431_v22  ;;  %v814_v24 = vpop.f32.mrb[1].mxu0 }
  0xfa   : > { %436 = vst.msk [vmem:[%s333_s21] sm:$0xff] %vm435_vm2, %v432_v23  ;;  %v514_v30 = vpop.f32.mrb[0].mxu1  ;;  %s1007_s21 = smov [#allocation2]  }
  0xfb   : > { %v825_v31 = vpop.f32.mrb[1].mxu1  ;;  %v515_v38 = vadd.f32 %v779_v37, %v514_v30  ;;  %s912_s0 = sshll.u32 %s1007_s21, 4  ;;  %s913_s0 = int_to_ptr.vmem [resolvable:$false] %s912_s0 }
  0xfc   : > { %s914_s14 = scalar_lea.vmem %s913_s0, 256  ;;  %p915_p0 = scmp.lt.s32.totalorder %s642_s16, %s913_s0 }
  0xfd   : > { %v518_v39 = vmul.f32 1.442695, %v515_v38  ;;  %p916_p1 = scmp.lt.s32.totalorder %s914_s14, %s908_s26 }
  0xff   : > { %v598_v26 = vpop.f32.mrb[2].mxu0  ;;  %p917_p2 = por %p916_p1, %p915_p0 }
 0x100   : > { %v599_v27 = vadd.f32 %v781_v25, %v598_v26  ;;  %v836_v28 = vpop.f32.mrb[3].mxu0 }
 0x101   : > { %p918_p3 = pnand %p917_p2, %p911_p13 }
 0x102   : > { %v603_v29 = vsel %vm602_vm3, %v599_v27, -inf }
 0x103   : > { %604 = vmax.xlane.f32.xlu0 %v603_v29 }
 0x190   : > { %v605_v32 = vpop.xlane.xlu0 %604 }
 0x191   : > { %v606_v33 = vsub.f32 %v599_v27, %v605_v32 }
 0x193   : > { %v607_v34 = vmul.f32 1.442695, %v606_v33 }
 0x195   : > { %902 = vpow2.f32 %v607_v34 }
 0x196   : > { %904 = vpow2.f32 %v518_v39 }
 0x19f   : > { %v1173_v35 = vpop.eup %902 }
 0x1a0   : > { %v609_v36 = vsel %vm602_vm3, %v1173_v35, 0.0  ;;  %v905_v40 = vpop.eup %904 }
 0x1a1   : > { %610 = vadd.xlane.f32.xlu0 %v609_v36  ;;  %520 = vst.msk [vmem:[%s1183_s17] sm:$0xff] %vm435_vm2, %v905_v40 }
 0x1a2   : > { %921 = shalt.err (!%p918_p3)
}
 0x1a3   : > { %s922_s23 = scalar_lea.hbm %s1192_s22, 128  ;;  %s926_s21 = scalar_lea.hbm %s1270_s8, 256 }
 0x1a4   : > { %p923_p4 = scmp.ne.s32.totalorder %s1192_s22, %s922_s23  ;;  %p927_p9 = scmp.lt.u32.totalorder %s1192_s22, %s1270_s8 }
 0x1a5   : > { %p928_p10 = scmp.lt.u32.totalorder %s926_s21, %s922_s23  ;;  %p930_p12 = scmp.lt.u32.totalorder %s922_s23, %s1192_s22 }
 0x1a6   : > { %p924_p7 = pnand %p923_p4, %p1097_p5 }
 0x1a7   : > { %p929_p11 = por %p928_p10, %p927_p9 }
 0x1a8   : > { %p925_p8 = pneg %p924_p7 }
 0x1a9   : > { %p931_p13 = por %p930_p12, %p929_p11 }
 0x1ab   : > { %p932_p0 = pnand %p931_p13, %p925_p8 }
 0x1ad   : > { %935 = shalt.err (!%p932_p0)
}
 0x1ae   : > { %855 = dma.vmem_to_hbm [thread:$0]  (%p1097_p5), %s642_s16, 128, %s1192_s22, %s620_s25  }
 0x1af   : > { %s1284_s27 = sshll.u32 %s1080_s13, 7  ;;  %s654_s24 = sshll.u32 %s1183_s17, 4  ;;  %s655_s24 = int_to_ptr.vmem [resolvable:$true] %s654_s24 }
 0x1b0   : > { %s1217_s1 = scalar_lea.hbm %s1271_s9, %s1284_s27  ;;  %s625_s23 = scalar_lea.sflag [#allocation5], %s1160_s28 }
 0x1b1   : > { %s936_s21 = scalar_lea.vmem %s655_s24, 128  ;;  %s1008_s0 = smov [#allocation4]  }
 0x1b2   : > { %p937_p1 = scmp.ne.s32.totalorder %s655_s24, %s936_s21  ;;  %s940_s2 = sshll.u32 %s1008_s0, 4  ;;  %s941_s2 = int_to_ptr.vmem [resolvable:$false] %s940_s2 }
 0x1b3   : > { %s942_s3 = scalar_lea.vmem %s941_s2, 256  ;;  %p943_p4 = scmp.lt.s32.totalorder %s655_s24, %s941_s2 }
 0x1b4   : > { %p938_p2 = pnand %p937_p1, %p1097_p5  ;;  %p944_p7 = scmp.lt.s32.totalorder %s942_s3, %s936_s21 }
 0x1b6   : > { %p939_p3 = pneg %p938_p2  ;;  %p945_p8 = por %p944_p7, %p943_p4 }
 0x1b8   : > { %p946_p9 = pnand %p945_p8, %p939_p3 }
 0x1ba   : > { %949 = shalt.err (!%p946_p9)
}
 0x1bb   : > { %s950_s13 = scalar_lea.hbm %s1217_s1, 128  ;;  %s954_s16 = scalar_lea.hbm %s1271_s9, 256 }
 0x1bc   : > { %p951_p10 = scmp.ne.s32.totalorder %s1217_s1, %s950_s13  ;;  %p955_p13 = scmp.lt.u32.totalorder %s1217_s1, %s1271_s9 }
 0x1bd   : > { %p956_p0 = scmp.lt.u32.totalorder %s954_s16, %s950_s13  ;;  %p958_p2 = scmp.lt.u32.totalorder %s950_s13, %s1217_s1 }
 0x1be   : > { %p952_p11 = pnand %p951_p10, %p1097_p5 }
 0x1bf   : > { %p957_p1 = por %p956_p0, %p955_p13 }
 0x1c0   : > { %p953_p12 = pneg %p952_p11 }
 0x1c1   : > { %p959_p3 = por %p958_p2, %p957_p1 }
 0x1c3   : > { %p960_p4 = pnand %p959_p3, %p953_p12 }
 0x1c5   : > { %963 = shalt.err (!%p960_p4)
}
 0x1c6   : > { %856 = dma.vmem_to_hbm [thread:$0]  (%p1097_p5), %s655_s24, 128, %s1217_s1, %s625_s23  }
 0x1c7   : > { %s1285_s3 = sshll.u32 %s1123_s29, 3 }
 0x1c8   : > { %s348_s26 = scalar_lea.vmem %s1269_s7, %s1285_s3 }
 0x22e   : > { %v611_v41 = vpop.xlane.xlu0 %610 }
 0x22f   : > { %906 = vrcp.f32 %v611_v41 }
 0x239   : > { %v907_v42 = vpop.eup %906 }
 0x23a   : > { %v613_v43 = vmul.f32 %v907_v42, %v1173_v35 }
 0x23c   : > { %614 = vst.msk [vmem:[%s348_s26] sm:$0xff] %vm602_vm3, %v613_v43 }
 0x23d PF: > { %p866_p7 = scmp.ge.s32.totalorder %s1002_s12, 2  ;;  %s673_s19 = sand.u32 1, %s990_s30  }
 0x23e   : > { %s674_s14 = scalar_lea.sflag [#allocation3], %s673_s19 }
 0x23f   : > { %p860_p5 = pnand %p866_p7, %p1101_p6 }
 0x241   : > { %981 = dma.done.wait (!%p860_p5), %s674_s14, 128  }
 0x242   : > { %983 = vsyncadd (!%p860_p5), %s674_s14, 4294967168  ;;  %s683_s29 = scalar_lea.sflag [#allocation5], %s673_s19 }
 0x243   : > { %985 = dma.done.wait (!%p860_p5), %s683_s29, 128  }
 0x244   : > { %987 = vsyncadd (!%p860_p5), %s683_s29, 4294967168  ;;  %p23_p8 = scmp.ge.s32.totalorder %s1084_s15, 4   ;;  %s1286_s30 = smov %s994_s10 }
 0x245   : > { %s1287_s10 = smov %s998_s11  ;;  %s1288_s11 = smov %s1095_s18 }
 0x246   : > { %s1289_s12 = smov %s1084_s15  ;;  %25 = sbr.rel (!%p23_p8) target bundleno = 10 (0xa), region = 112 }
 0x24d   :  { %688 = vsyncpa [#allocation3], 1 }
 0x24e   :  { %690 = vsyncpa [#allocation3 + $0x1], 1 }
 0x24f   :  { %691 = vsyncpa [#allocation5], 1 }
 0x250   :  { %693 = vsyncpa [#allocation5 + $0x1], 1 }

</bundles_post_ra>
